<compile_context>
chip_gen: v7x
topology: tpu7x:2x2x1
jax: 0.10.0
libtpu: 0.0.40
codegen_flags: <defaults>
</compile_context>

<pallas_src>
import functools

import jax
import jax.numpy as jnp
from jax.experimental import pallas as pl
from jax.experimental.pallas import tpu as pltpu


def _gating_kernel(x_ref, w1_ref, b1_ref, w2_ref, b2_ref,
                   w3_ref, b3_ref, w4_ref, b4_ref, o_ref,
                   *, num_experts, e_pad):
    bf16 = jnp.bfloat16
    f32 = jnp.float32

    x = x_ref[...]  # bf16 tile [TM, D]

    # layer1 + ReLU   (dropout1: identity at inference)
    h = jnp.dot(x, w1_ref[...], preferred_element_type=f32) + b1_ref[...]
    h = jnp.maximum(h, 0.0)

    # layer2 + LeakyReLU(0.01)   (dropout2: identity at inference)
    h = jnp.dot(h.astype(bf16), w2_ref[...], preferred_element_type=f32) + b2_ref[...]
    h = jnp.where(h > 0.0, h, 0.01 * h)

    # layer3 + LeakyReLU(0.01)   (dropout3: identity at inference)
    h = jnp.dot(h.astype(bf16), w3_ref[...], preferred_element_type=f32) + b3_ref[...]
    h = jnp.where(h > 0.0, h, 0.01 * h)

    # layer4 (expert axis padded to e_pad lanes) + softmax over real experts
    logits = jnp.dot(h.astype(bf16), w4_ref[...], preferred_element_type=f32) + b4_ref[...]
    if num_experts < e_pad:
        lane = jax.lax.broadcasted_iota(jnp.int32, logits.shape, 1)
        logits = jnp.where(lane < num_experts, logits, -jnp.inf)

    m = jnp.max(logits, axis=1, keepdims=True)
    e = jnp.exp(logits - m)
    denom = jnp.sum(e, axis=1, keepdims=True)
    probs = e * pl.reciprocal(denom, approx=False)

    # Lane-dense store: last dim of the out tile is e_pad (multiple of 128).
    o_ref[...] = probs.astype(o_ref.dtype)


def gating_forward(x, params, *, tm=None):
    """x: [B, input_dim] float32/bfloat16.  Returns softmax probs [B, num_experts] f32."""
    B, D = x.shape
    E = params["w4"].shape[1]
    E_pad = max(128, ((E + 127) // 128) * 128)

    # Weights in bf16 (MXU-native), biases in f32 (added after f32 accumulation).
    w1 = params["w1"].astype(jnp.bfloat16)
    w2 = params["w2"].astype(jnp.bfloat16)
    w3 = params["w3"].astype(jnp.bfloat16)
    w4 = params["w4"].astype(jnp.bfloat16)
    b1 = params["b1"].astype(jnp.float32)
    b2 = params["b2"].astype(jnp.float32)
    b3 = params["b3"].astype(jnp.float32)
    b4 = params["b4"].astype(jnp.float32)
    if E < E_pad:  # pad expert axis -> lane-dense output slab
        w4 = jnp.pad(w4, ((0, 0), (0, E_pad - E)))
        b4 = jnp.pad(b4, ((0, 0), (0, E_pad - E)))

    # Batch tile: big enough to keep the MXU fed, clamped to B, multiple of 8.
    if tm is None:
        tm = 512
    tm = min(tm, B)
    if tm != B:
        tm = max(8, (tm // 8) * 8)
    grid = (pl.cdiv(B, tm),)

    x_bf = x.astype(jnp.bfloat16)

    const = lambda i: (0, 0)  # weights/biases: same block every step -> resident
    in_specs = [
        pl.BlockSpec((tm, D), lambda i: (i, 0)),          # x tile (pipelined)
        pl.BlockSpec((D, 128), const), pl.BlockSpec((1, 128), const),
        pl.BlockSpec((128, 256), const), pl.BlockSpec((1, 256), const),
        pl.BlockSpec((256, 128), const), pl.BlockSpec((1, 128), const),
        pl.BlockSpec((128, E_pad), const), pl.BlockSpec((1, E_pad), const),
    ]
    out_specs = pl.BlockSpec((tm, E_pad), lambda i: (i, 0))

    # VMEM budget: resident weights + double-buffered x/out tiles + f32 temps.
    weight_bytes = sum(int(a.size) * a.dtype.itemsize
                       for a in (w1, b1, w2, b2, w3, b3, w4, b4))
    need = (weight_bytes
            + 2 * tm * D * 2          # x tiles (bf16, double-buffered)
            + 2 * tm * E_pad * 4      # out tiles (f32, double-buffered)
            + 6 * tm * 256 * 4)       # f32 intermediates headroom
    vmem_limit = int(min(max(2 * need, 16 * 2**20), 48 * 2**20))

    flops = 2 * B * (D * 128 + 128 * 256 + 256 * 128 + 128 * E_pad)
    bytes_accessed = int(B * D * 2 + weight_bytes + B * E_pad * 4)
    cost = pl.CostEstimate(flops=flops, transcendentals=B * E_pad,
                           bytes_accessed=bytes_accessed)

    kernel = functools.partial(_gating_kernel, num_experts=E, e_pad=E_pad)

    out_padded = pl.pallas_call(
        kernel,
        grid=grid,
        in_specs=in_specs,
        out_specs=out_specs,
        out_shape=jax.ShapeDtypeStruct((B, E_pad), jnp.float32),
        compiler_params=pltpu.CompilerParams(
            dimension_semantics=("parallel",),
            vmem_limit_bytes=vmem_limit),
        cost_estimate=cost,
    )(x_bf, w1, b1, w2, b2, w3, b3, w4, b4)

    if E < E_pad:
        return out_padded[:, :E]
    return out_padded


def init_params(key, input_dim, num_experts):
    """Deterministic synthetic init (nn.Linear shapes, stored as [in,out] / [1,out])."""
    dims = [(input_dim, 128), (128, 256), (256, 128), (128, num_experts)]
    params = {}
    for i, (fin, fout) in enumerate(dims, start=1):
        key, kw, kb = jax.random.split(key, 3)
        scale = 1.0 / jnp.sqrt(jnp.float32(fin))
        params[f"w{i}"] = (jax.random.uniform(kw, (fin, fout), jnp.float32,
                                              minval=-1.0, maxval=1.0) * scale
                           ).astype(jnp.bfloat16)
        params[f"b{i}"] = (jax.random.uniform(kb, (1, fout), jnp.float32,
                                              minval=-1.0, maxval=1.0) * scale)
    return params


def gating_reference_bf16(x, p):
    """Pure-JAX reference with the same bf16-operand / f32-accumulate recipe."""
    f32, bf16 = jnp.float32, jnp.bfloat16
    mm = lambda a, w: jnp.dot(a.astype(bf16), w.astype(bf16),
                              preferred_element_type=f32)
    h = jnp.maximum(mm(x, p["w1"]) + p["b1"].astype(f32), 0.0)
    h = mm(h, p["w2"]) + p["b2"].astype(f32)
    h = jnp.where(h > 0, h, 0.01 * h)
    h = mm(h, p["w3"]) + p["b3"].astype(f32)
    h = jnp.where(h > 0, h, 0.01 * h)
    logits = mm(h, p["w4"]) + p["b4"].astype(f32)
    return jax.nn.softmax(logits, axis=1)


def gating_reference_f32(x, p):
    """Full-f32 reference (weights dequantized exactly from bf16)."""
    w = {k: v.astype(jnp.float32) for k, v in p.items()}
    h = jnp.maximum(x @ w["w1"] + w["b1"], 0.0)
    h = x @ w["w1"] if False else h  # keep linter quiet
    h2 = h @ w["w2"] + w["b2"]
    h2 = jnp.where(h2 > 0, h2, 0.01 * h2)
    h3 = h2 @ w["w3"] + w["b3"]
    h3 = jnp.where(h3 > 0, h3, 0.01 * h3)
    logits = h3 @ w["w4"] + w["b4"]
    return jax.nn.softmax(logits, axis=1)


if __name__ == "__main__":
    key = jax.random.PRNGKey(0)
    kx, kp, kx2 = jax.random.split(key, 3)

    # Case 1: small module-consistent shapes.
    B, D, E = 8, 32, 8
    params = init_params(kp, D, E)
    x = jax.random.normal(kx, (B, D), jnp.float32)

    out = jax.block_until_ready(gating_forward(x, params))
    assert out.shape == (B, E)
    assert jnp.allclose(jnp.sum(out, axis=1), 1.0, atol=1e-4)
    assert jnp.allclose(out, gating_reference_bf16(x, params), atol=1e-3, rtol=1e-3)
    assert jnp.allclose(out, gating_reference_f32(x, params), atol=3e-2, rtol=3e-2)

    # Case 2: exercise the batch grid (multiple tiles, weights stay resident).
    B2, D2, E2 = 256, 64, 8
    params2 = init_params(jax.random.PRNGKey(1), D2, E2)
    x2 = jax.random.normal(kx2, (B2, D2), jnp.float32)
    out2 = jax.block_until_ready(gating_forward(x2, params2, tm=128))
    assert out2.shape == (B2, E2)
    assert jnp.allclose(jnp.sum(out2, axis=1), 1.0, atol=1e-4)
    assert jnp.allclose(out2, gating_reference_bf16(x2, params2), atol=1e-3, rtol=1e-3)

    print("KERNEL_OK")
</pallas_src>

<mosaic_0001>
module attributes {stable_mosaic.version = 11 : i64} {
  func.func @_gating_kernel(%arg0: i32, %arg1: memref<8x32xbf16, #tpu.memory_space<vmem>>, %arg2: memref<32x128xbf16, #tpu.memory_space<vmem>>, %arg3: memref<1x128xf32, #tpu.memory_space<vmem>>, %arg4: memref<128x256xbf16, #tpu.memory_space<vmem>>, %arg5: memref<1x256xf32, #tpu.memory_space<vmem>>, %arg6: memref<256x128xbf16, #tpu.memory_space<vmem>>, %arg7: memref<1x128xf32, #tpu.memory_space<vmem>>, %arg8: memref<128x128xbf16, #tpu.memory_space<vmem>>, %arg9: memref<1x128xf32, #tpu.memory_space<vmem>>, %arg10: memref<8x128xf32, #tpu.memory_space<vmem>>) attributes {dimension_semantics = [#tpu.dimension_semantics<parallel>], iteration_bounds = array<i64: 1>, scalar_prefetch = 0 : i64, scratch_operands = 0 : i64, tpu.core_type = #tpu.core_type<tc>, window_params = [{transform_indices = @transform_0, window_bounds = array<i64: 8, 32>}, {pipeline_mode = #tpu.pipeline_mode<synchronous>, transform_indices = @transform_1, window_bounds = array<i64: 32, 128>}, {pipeline_mode = #tpu.pipeline_mode<synchronous>, transform_indices = @transform_2, window_bounds = array<i64: 1, 128>}, {pipeline_mode = #tpu.pipeline_mode<synchronous>, transform_indices = @transform_3, window_bounds = array<i64: 128, 256>}, {pipeline_mode = #tpu.pipeline_mode<synchronous>, transform_indices = @transform_4, window_bounds = array<i64: 1, 256>}, {pipeline_mode = #tpu.pipeline_mode<synchronous>, transform_indices = @transform_5, window_bounds = array<i64: 256, 128>}, {pipeline_mode = #tpu.pipeline_mode<synchronous>, transform_indices = @transform_6, window_bounds = array<i64: 1, 128>}, {pipeline_mode = #tpu.pipeline_mode<synchronous>, transform_indices = @transform_7, window_bounds = array<i64: 128, 128>}, {pipeline_mode = #tpu.pipeline_mode<synchronous>, transform_indices = @transform_8, window_bounds = array<i64: 1, 128>}, {transform_indices = @transform_9, window_bounds = array<i64: 8, 128>}]} {
    %c0 = arith.constant 0 : index
    %c0_0 = arith.constant 0 : index
    %0 = vector.load %arg1[%c0, %c0_0] : memref<8x32xbf16, #tpu.memory_space<vmem>>, vector<8x32xbf16>
    %c0_1 = arith.constant 0 : index
    %c0_2 = arith.constant 0 : index
    %1 = vector.load %arg2[%c0_1, %c0_2] : memref<32x128xbf16, #tpu.memory_space<vmem>>, vector<32x128xbf16>
    %cst = arith.constant dense<0.000000e+00> : vector<8x128xf32>
    %2 = tpu.matmul %0, %1, %cst {dimension_numbers = #tpu.dot_dimension_numbers<[1], [0], [0], [1], [0, 0, 1, 1], [], []>} : vector<8x32xbf16>, vector<32x128xbf16>, vector<8x128xf32> -> vector<8x128xf32>
    %c0_3 = arith.constant 0 : index
    %c0_4 = arith.constant 0 : index
    %3 = vector.load %arg3[%c0_3, %c0_4] : memref<1x128xf32, #tpu.memory_space<vmem>>, vector<1x128xf32>
    %4 = vector.broadcast %3 : vector<1x128xf32> to vector<8x128xf32>
    %5 = arith.addf %2, %4 : vector<8x128xf32>
    %cst_5 = arith.constant 0.000000e+00 : f32
    %6 = vector.broadcast %cst_5 : f32 to vector<8x128xf32>
    %7 = arith.maximumf %5, %6 : vector<8x128xf32>
    %8 = arith.truncf %7 : vector<8x128xf32> to vector<8x128xbf16>
    %c0_6 = arith.constant 0 : index
    %c0_7 = arith.constant 0 : index
    %9 = vector.load %arg4[%c0_6, %c0_7] : memref<128x256xbf16, #tpu.memory_space<vmem>>, vector<128x256xbf16>
    %cst_8 = arith.constant dense<0.000000e+00> : vector<8x256xf32>
    %10 = tpu.matmul %8, %9, %cst_8 {dimension_numbers = #tpu.dot_dimension_numbers<[1], [0], [0], [1], [0, 0, 1, 1], [], []>} : vector<8x128xbf16>, vector<128x256xbf16>, vector<8x256xf32> -> vector<8x256xf32>
    %c0_9 = arith.constant 0 : index
    %c0_10 = arith.constant 0 : index
    %11 = vector.load %arg5[%c0_9, %c0_10] : memref<1x256xf32, #tpu.memory_space<vmem>>, vector<1x256xf32>
    %12 = vector.broadcast %11 : vector<1x256xf32> to vector<8x256xf32>
    %13 = arith.addf %10, %12 : vector<8x256xf32>
    %cst_11 = arith.constant 0.000000e+00 : f32
    %14 = vector.broadcast %cst_11 : f32 to vector<8x256xf32>
    %15 = arith.cmpf ogt, %13, %14 : vector<8x256xf32>
    %cst_12 = arith.constant 0.00999999977 : f32
    %16 = vector.broadcast %cst_12 : f32 to vector<8x256xf32>
    %17 = arith.mulf %16, %13 : vector<8x256xf32>
    %18 = arith.select %15, %13, %17 : vector<8x256xi1>, vector<8x256xf32>
    %19 = arith.truncf %18 : vector<8x256xf32> to vector<8x256xbf16>
    %c0_13 = arith.constant 0 : index
    %c0_14 = arith.constant 0 : index
    %20 = vector.load %arg6[%c0_13, %c0_14] : memref<256x128xbf16, #tpu.memory_space<vmem>>, vector<256x128xbf16>
    %cst_15 = arith.constant dense<0.000000e+00> : vector<8x128xf32>
    %21 = tpu.matmul %19, %20, %cst_15 {dimension_numbers = #tpu.dot_dimension_numbers<[1], [0], [0], [1], [0, 0, 1, 1], [], []>} : vector<8x256xbf16>, vector<256x128xbf16>, vector<8x128xf32> -> vector<8x128xf32>
    %c0_16 = arith.constant 0 : index
    %c0_17 = arith.constant 0 : index
    %22 = vector.load %arg7[%c0_16, %c0_17] : memref<1x128xf32, #tpu.memory_space<vmem>>, vector<1x128xf32>
    %23 = vector.broadcast %22 : vector<1x128xf32> to vector<8x128xf32>
    %24 = arith.addf %21, %23 : vector<8x128xf32>
    %cst_18 = arith.constant 0.000000e+00 : f32
    %25 = vector.broadcast %cst_18 : f32 to vector<8x128xf32>
    %26 = arith.cmpf ogt, %24, %25 : vector<8x128xf32>
    %cst_19 = arith.constant 0.00999999977 : f32
    %27 = vector.broadcast %cst_19 : f32 to vector<8x128xf32>
    %28 = arith.mulf %27, %24 : vector<8x128xf32>
    %29 = arith.select %26, %24, %28 : vector<8x128xi1>, vector<8x128xf32>
    %30 = arith.truncf %29 : vector<8x128xf32> to vector<8x128xbf16>
    %c0_20 = arith.constant 0 : index
    %c0_21 = arith.constant 0 : index
    %31 = vector.load %arg8[%c0_20, %c0_21] : memref<128x128xbf16, #tpu.memory_space<vmem>>, vector<128x128xbf16>
    %cst_22 = arith.constant dense<0.000000e+00> : vector<8x128xf32>
    %32 = tpu.matmul %30, %31, %cst_22 {dimension_numbers = #tpu.dot_dimension_numbers<[1], [0], [0], [1], [0, 0, 1, 1], [], []>} : vector<8x128xbf16>, vector<128x128xbf16>, vector<8x128xf32> -> vector<8x128xf32>
    %c0_23 = arith.constant 0 : index
    %c0_24 = arith.constant 0 : index
    %33 = vector.load %arg9[%c0_23, %c0_24] : memref<1x128xf32, #tpu.memory_space<vmem>>, vector<1x128xf32>
    %34 = vector.broadcast %33 : vector<1x128xf32> to vector<8x128xf32>
    %35 = arith.addf %32, %34 : vector<8x128xf32>
    %36 = tpu.iota {dimensions = array<i32: 1>} : vector<8x128xi32>
    %c8_i32 = arith.constant 8 : i32
    %37 = vector.broadcast %c8_i32 : i32 to vector<8x128xi32>
    %38 = arith.cmpi slt, %36, %37 : vector<8x128xi32>
    %cst_25 = arith.constant 0xFF800000 : f32
    %39 = vector.broadcast %cst_25 : f32 to vector<8x128xf32>
    %40 = arith.select %38, %35, %39 : vector<8x128xi1>, vector<8x128xf32>
    %cst_26 = arith.constant dense<0xFF800000> : vector<8xf32>
    %41 = vector.multi_reduction <maximumf>, %40, %cst_26 [1] : vector<8x128xf32> to vector<8xf32>
    %42 = vector.shape_cast %41 : vector<8xf32> to vector<8x1xf32>
    %43 = vector.broadcast %42 : vector<8x1xf32> to vector<8x128xf32>
    %44 = arith.subf %40, %43 : vector<8x128xf32>
    %45 = math.exp %44 : vector<8x128xf32>
    %cst_27 = arith.constant dense<0.000000e+00> : vector<8xf32>
    %46 = vector.multi_reduction <add>, %45, %cst_27 [1] : vector<8x128xf32> to vector<8xf32>
    %47 = vector.shape_cast %46 : vector<8xf32> to vector<8x1xf32>
    %48 = tpu.reciprocal %47 : vector<8x1xf32> -> vector<8x1xf32>
    %49 = vector.broadcast %48 : vector<8x1xf32> to vector<8x128xf32>
    %50 = arith.mulf %45, %49 : vector<8x128xf32>
    %c0_28 = arith.constant 0 : index
    %c0_29 = arith.constant 0 : index
    %51 = vector.load %arg10[%c0_28, %c0_29] : memref<8x128xf32, #tpu.memory_space<vmem>>, vector<8x128xf32>
    tpu.vector_store %arg10[%c0_28, %c0_29], %50 {strides = array<i32>} : memref<8x128xf32, #tpu.memory_space<vmem>>, vector<8x128xf32>,
    return
  }
  func.func @transform_0(%arg0: i32) -> (i32, i32) {
    %c0_i32 = arith.constant 0 : i32
    %c0_i32_0 = arith.constant 0 : i32
    return %arg0, %c0_i32 : i32, i32
  }
  func.func @transform_1(%arg0: i32) -> (i32, i32) {
    %c0_i32 = arith.constant 0 : i32
    %c0_i32_0 = arith.constant 0 : i32
    %c0_i32_1 = arith.constant 0 : i32
    return %c0_i32, %c0_i32_0 : i32, i32
  }
  func.func @transform_2(%arg0: i32) -> (i32, i32) {
    %c0_i32 = arith.constant 0 : i32
    %c0_i32_0 = arith.constant 0 : i32
    %c0_i32_1 = arith.constant 0 : i32
    return %c0_i32, %c0_i32_0 : i32, i32
  }
  func.func @transform_3(%arg0: i32) -> (i32, i32) {
    %c0_i32 = arith.constant 0 : i32
    %c0_i32_0 = arith.constant 0 : i32
    %c0_i32_1 = arith.constant 0 : i32
    return %c0_i32, %c0_i32_0 : i32, i32
  }
  func.func @transform_4(%arg0: i32) -> (i32, i32) {
    %c0_i32 = arith.constant 0 : i32
    %c0_i32_0 = arith.constant 0 : i32
    %c0_i32_1 = arith.constant 0 : i32
    return %c0_i32, %c0_i32_0 : i32, i32
  }
  func.func @transform_5(%arg0: i32) -> (i32, i32) {
    %c0_i32 = arith.constant 0 : i32
    %c0_i32_0 = arith.constant 0 : i32
    %c0_i32_1 = arith.constant 0 : i32
    return %c0_i32, %c0_i32_0 : i32, i32
  }
  func.func @transform_6(%arg0: i32) -> (i32, i32) {
    %c0_i32 = arith.constant 0 : i32
    %c0_i32_0 = arith.constant 0 : i32
    %c0_i32_1 = arith.constant 0 : i32
    return %c0_i32, %c0_i32_0 : i32, i32
  }
  func.func @transform_7(%arg0: i32) -> (i32, i32) {
    %c0_i32 = arith.constant 0 : i32
    %c0_i32_0 = arith.constant 0 : i32
    %c0_i32_1 = arith.constant 0 : i32
    return %c0_i32, %c0_i32_0 : i32, i32
  }
  func.func @transform_8(%arg0: i32) -> (i32, i32) {
    %c0_i32 = arith.constant 0 : i32
    %c0_i32_0 = arith.constant 0 : i32
    %c0_i32_1 = arith.constant 0 : i32
    return %c0_i32, %c0_i32_0 : i32, i32
  }
  func.func @transform_9(%arg0: i32) -> (i32, i32) {
    %c0_i32 = arith.constant 0 : i32
    %c0_i32_0 = arith.constant 0 : i32
    return %arg0, %c0_i32 : i32, i32
  }
}

</mosaic_0001>

<bundles_post_ra>
// kernel: tpu_custom_call.1
= control target key start
LH: loop header
LB: loop body
LE: loop exit
PB: predicated region body
PF: predicated region fallthrough
CT: control target
= control target key end

     0   :  { %14 = vsyncpa [#allocation3], 0  ;;  %s1133_s0 = inlined_call_operand.hbm [shape: bf16[8,32], index: 0, kind: input, shape index: {}]   ;;  %s1134_s1 = inlined_call_operand.hbm [shape: bf16[32,128], index: 1, kind: input, shape index: {}]   ;;  %s1135_s2 = inlined_call_operand.vmem [shape: f32[1,128], index: 2, kind: input, shape index: {}]   ;;  %s1136_s3 = inlined_call_operand.hbm [shape: bf16[128,256], index: 3, kind: input, shape index: {}]   ;;  %s1137_s4 = inlined_call_operand.vmem [shape: f32[1,256], index: 4, kind: input, shape index: {}]   ;;  %s1138_s5 = inlined_call_operand.hbm [shape: bf16[256,128], index: 5, kind: input, shape index: {}]   ;;  %s1139_s6 = inlined_call_operand.vmem [shape: f32[1,128], index: 6, kind: input, shape index: {}]   ;;  %s1140_s7 = inlined_call_operand.hbm [shape: bf16[128,128], index: 7, kind: input, shape index: {}]   ;;  %s1141_s8 = inlined_call_operand.vmem [shape: f32[1,128], index: 8, kind: input, shape index: {}]   ;;  %s1142_s9 = inlined_call_operand.hbm [shape: f32[8,128], index: 9, kind: output, shape index: {}]  }
   0x1   :  { %15 = vsyncpa [#allocation6], 0 }
   0x2   :  { %16 = vsyncpa [#allocation9], 0 }
   0x3   :  { %17 = vsyncpa [#allocation4], 0  ;;  %s963_s30 = smov [#allocation5]   ;;  %s823_s13 = scalar_lea.hbm %s1134_s1, 256 }
   0x4   :  { %s33_s10 = sshll.u32 %s963_s30, 4  ;;  %p824_p0 = scmp.ne.s32.totalorder %s1134_s1, %s823_s13  ;;  %s34_s10 = int_to_ptr.vmem [resolvable:$true] %s33_s10 }
   0x5   :  { %p827_p1 = scmp.lt.u32.totalorder %s823_s13, %s1134_s1 }
   0x7   :  { %p829_p2 = pnand %p827_p1, %p824_p0 }
   0x9   :  { %832 = shalt.err (!%p829_p2)
}
   0xa   :  { %s833_s18 = scalar_lea.vmem %s34_s10, 256  ;;  %p838_p4 = scmp.lt.s32.totalorder %s34_s10, %s34_s10 }
   0xb   :  { %p834_p3 = scmp.ne.s32.totalorder %s34_s10, %s833_s18  ;;  %p839_p5 = scmp.lt.s32.totalorder %s833_s18, %s833_s18 }
   0xd   :  { %p840_p6 = por %p839_p5, %p838_p4 }
   0xf   :  { %p841_p7 = pnand %p840_p6, %p834_p3 }
  0x11   :  { %844 = shalt.err (!%p841_p7)
}
  0x12   :  { %s964_s19 = smov 64   ;;  %s965_s20 = smov 4  }
  0x13   :  { %39 = dma.hbm_to_vmem [thread:$0]  %s1134_s1, 256, %s34_s10, [#allocation6], %s964_s19, %s964_s19, %s965_s20  }
  0x14   :  { %s966_s23 = smov [#allocation8]   ;;  %s967_s25 = smov [#allocation2]  }
  0x15   :  { %s61_s24 = sshll.u32 %s966_s23, 4  ;;  %s24_s26 = sshll.u32 %s967_s25, 4  ;;  %s62_s24 = int_to_ptr.vmem [resolvable:$true] %s61_s24  ;;  %s25_s26 = int_to_ptr.vmem [resolvable:$true] %s24_s26 }
  0x16   :  { %s845_s29 = scalar_lea.hbm %s1138_s5, 2048 }
  0x17   :  { %p846_p8 = scmp.ne.s32.totalorder %s1138_s5, %s845_s29  ;;  %p849_p9 = scmp.lt.u32.totalorder %s845_s29, %s1138_s5 }
  0x19   :  { %p851_p10 = pnand %p849_p9, %p846_p8 }
  0x1b   :  { %854 = shalt.err (!%p851_p10)
}
  0x1c   :  { %s855_s1 = scalar_lea.vmem %s62_s24, 2048  ;;  %p860_p12 = scmp.lt.s32.totalorder %s62_s24, %s62_s24 }
  0x1d   :  { %p856_p11 = scmp.ne.s32.totalorder %s62_s24, %s855_s1  ;;  %p861_p13 = scmp.lt.s32.totalorder %s855_s1, %s855_s1 }
  0x1f   :  { %p862_p0 = por %p861_p13, %p860_p12 }
  0x21   :  { %p863_p1 = pnand %p862_p0, %p856_p11 }
  0x23   :  { %866 = shalt.err (!%p863_p1)
}
  0x24   :  { %67 = dma.hbm_to_vmem [thread:$0]  %s1138_s5, 2048, %s62_s24, [#allocation9], %s964_s19, %s964_s19, %s965_s20  }
  0x25   :  { %s867_s17 = scalar_lea.hbm %s1133_s0, 64 }
  0x26   :  { %p868_p2 = scmp.ne.s32.totalorder %s1133_s0, %s867_s17  ;;  %p871_p3 = scmp.lt.u32.totalorder %s867_s17, %s1133_s0 }
  0x28   :  { %p873_p4 = pnand %p871_p3, %p868_p2 }
  0x2a   :  { %876 = shalt.err (!%p873_p4)
}
  0x2b   :  { %s877_s25 = scalar_lea.vmem %s25_s26, 64  ;;  %p882_p6 = scmp.lt.s32.totalorder %s25_s26, %s25_s26 }
  0x2c   :  { %p878_p5 = scmp.ne.s32.totalorder %s25_s26, %s877_s25  ;;  %p883_p7 = scmp.lt.s32.totalorder %s877_s25, %s877_s25 }
  0x2e   :  { %p884_p8 = por %p883_p7, %p882_p6 }
  0x30   :  { %p885_p9 = pnand %p884_p8, %p878_p5 }
  0x32   :  { %888 = shalt.err (!%p885_p9)
}
  0x33   :  { %27 = dma.hbm_to_vmem [thread:$0]  %s1133_s0, 64, %s25_s26, [#allocation3]  }
  0x34   :  { %s968_s27 = smov [#allocation7]   ;;  %s889_s11 = scalar_lea.hbm %s1136_s3, 2048 }
  0x35   :  { %s47_s28 = sshll.u32 %s968_s27, 4  ;;  %p890_p10 = scmp.ne.s32.totalorder %s1136_s3, %s889_s11  ;;  %s48_s28 = int_to_ptr.vmem [resolvable:$true] %s47_s28 }
  0x36   :  { %p893_p11 = scmp.lt.u32.totalorder %s889_s11, %s1136_s3 }
  0x38   :  { %p895_p12 = pnand %p893_p11, %p890_p10 }
  0x3a   :  { %898 = shalt.err (!%p895_p12)
}
  0x3b   :  { %s899_s14 = scalar_lea.vmem %s48_s28, 2048  ;;  %p904_p0 = scmp.lt.s32.totalorder %s48_s28, %s48_s28 }
  0x3c   :  { %p900_p13 = scmp.ne.s32.totalorder %s48_s28, %s899_s14  ;;  %p905_p1 = scmp.lt.s32.totalorder %s899_s14, %s899_s14 }
  0x3e   :  { %p906_p2 = por %p905_p1, %p904_p0 }
  0x40   :  { %p907_p3 = pnand %p906_p2, %p900_p13 }
  0x42   :  { %910 = shalt.err (!%p907_p3)
}
  0x43   :  { %s969_s0 = smov 128   ;;  %s970_s26 = smov 8  }
  0x44   :  { %53 = dma.hbm_to_vmem [thread:$0]  %s1136_s3, 2048, %s48_s28, [#allocation6], %s969_s0, %s969_s0, %s970_s26  }
  0x45   :  { %s971_s17 = smov [#allocation10]   ;;  %s911_s23 = scalar_lea.hbm %s1140_s7, 1024 }
  0x46   :  { %s75_s18 = sshll.u32 %s971_s17, 4  ;;  %p912_p4 = scmp.ne.s32.totalorder %s1140_s7, %s911_s23  ;;  %s76_s18 = int_to_ptr.vmem [resolvable:$true] %s75_s18 }
  0x47   :  { %p915_p5 = scmp.lt.u32.totalorder %s911_s23, %s1140_s7 }
  0x49   :  { %p917_p6 = pnand %p915_p5, %p912_p4 }
  0x4b   :  { %920 = shalt.err (!%p917_p6)
}
  0x4c   :  { %s921_s29 = scalar_lea.vmem %s76_s18, 1024  ;;  %p926_p8 = scmp.lt.s32.totalorder %s76_s18, %s76_s18 }
  0x4d   :  { %p922_p7 = scmp.ne.s32.totalorder %s76_s18, %s921_s29  ;;  %p927_p9 = scmp.lt.s32.totalorder %s921_s29, %s921_s29 }
  0x4f   :  { %p928_p10 = por %p927_p9, %p926_p8 }
  0x51   :  { %p929_p11 = pnand %p928_p10, %p922_p7 }
  0x53   :  { %932 = shalt.err (!%p929_p11)
}
  0x54   :  { %81 = dma.hbm_to_vmem [thread:$0]  %s1140_s7, 1024, %s76_s18, [#allocation9], %s964_s19, %s964_s19, %s965_s20  }
  0x55   :  { %955 = dma.done.wait [#allocation3], 64  }
  0x56   :  { %956 = vsyncadd [#allocation3], 4294967232 }
  0x57   :  { %957 = dma.done.wait [#allocation6], 2304  }
  0x58   :  { %958 = vsyncadd [#allocation6], 4294964992 }
  0x59   :  { %959 = dma.done.wait [#allocation9], 3072  }
  0x5a   :  { %960 = vsyncadd [#allocation9], 4294964224  ;;  %v972_v0 = vmov 0.0   ;;  %vm973_vm0 = vmmov 0   ;;  %v769_v1 = vld [vmem:[#allocation5] sm:$0xff]   ;;  %v770_v2 = vld [vmem:[#allocation5 + $0x8] sm:$0xff]   ;;  %v188_v50 = vlaneseq }
  0x5b   :  { %728 = vmatprep.subr.bf16.mxu0 %v972_v0  ;;  %732 = vmatprep.mubr.msk.bf16.mxu0 %vm973_vm0, %v972_v0  ;;  %v771_v3 = vld [vmem:[#allocation7 + $0x4] ss:$8 sps:$4 sm:$0xff]   ;;  %v773_v4 = vld [vmem:[#allocation7] ss:$8 sps:$4 sm:$0xff]   ;;  %v774_v5 = vld [vmem:[#allocation7 + $0x14] ss:$8 sps:$4 sm:$0xff]  }
  0x5c   :  { %729 = vmatpush3.bf16.msra.mxu0 %v769_v1  ;;  %v100_v6 = vld [vmem:[#allocation2] sm:$0xf]  ;;  %278 = vmatprep.subr.bf16.mxu1 %v771_v3  ;;  %vm124_vm1 = vcmask 261120   ;;  %v776_v7 = vld [vmem:[#allocation7 + $0x10] ss:$8 sps:$4 sm:$0xff]   ;;  %v974_v20 = vmov 0  }
  0x5d   :  { %730 = vmatprep.subr.bf16.mxu0 %v972_v0  ;;  %279 = vmatpush1.bf16.msra.mxu1 %v773_v4  ;;  %v777_v8 = vld [vmem:[#allocation7 + $0x24] ss:$8 sps:$4 sm:$0xff]   ;;  %v779_v9 = vld [vmem:[#allocation7 + $0x20] ss:$8 sps:$4 sm:$0xff]   ;;  %v780_v10 = vld [vmem:[#allocation7 + $0x34] ss:$8 sps:$4 sm:$0xff]  }
  0x5e   :  { %280 = vmatprep.subr.bf16.mxu1 %v774_v5  ;;  %v782_v11 = vld [vmem:[#allocation7 + $0x30] ss:$8 sps:$4 sm:$0xff]   ;;  %v783_v12 = vld [vmem:[#allocation7 + $0x44] ss:$8 sps:$4 sm:$0xff]   ;;  %v785_v13 = vld [vmem:[#allocation7 + $0x40] ss:$8 sps:$4 sm:$0xff]   ;;  %310 = vmatprep.mubr.bf16.mxu1 %v974_v20 }
  0x5f   :  { %v786_v14 = vld [vmem:[#allocation7 + $0x54] ss:$8 sps:$4 sm:$0xff]   ;;  %v788_v15 = vld [vmem:[#allocation7 + $0x50] ss:$8 sps:$4 sm:$0xff]   ;;  %v789_v16 = vld [vmem:[#allocation7 + $0x64] ss:$8 sps:$4 sm:$0xff]  }
  0x60   :  { %731 = vmatpush3.bf16.msra.mxu0 %v770_v2  ;;  %v791_v17 = vld [vmem:[#allocation7 + $0x60] ss:$8 sps:$4 sm:$0xff]   ;;  %v792_v18 = vld [vmem:[#allocation7 + $0x74] ss:$8 sps:$4 sm:$0xff]   ;;  %v794_v19 = vld [vmem:[#allocation7 + $0x70] ss:$8 sps:$4 sm:$0xff]  }
  0x61   :  { %281 = vmatpush1.bf16.msra.mxu1 %v776_v7  ;;  %v795_v21 = vld [vmem:[#allocation8 + $0x40] sm:$0xff]   ;;  %v797_v23 = vld [vmem:[#allocation8 + $0x48] sm:$0xff]   ;;  %v799_v25 = vld [vmem:[#allocation8 + $0x50] sm:$0xff]   ;;  %v189_v51 = vshrl.u32 %v188_v50, 7 }
  0x62   :  { %282 = vmatprep.subr.bf16.mxu1 %v777_v8  ;;  %v796_v22 = vld [vmem:[#allocation8] sm:$0xff]   ;;  %697 = vmatprep.subr.bf16.mxu0 %v795_v21  ;;  %v798_v24 = vld [vmem:[#allocation8 + $0x8] sm:$0xff]   ;;  %v800_v26 = vld [vmem:[#allocation8 + $0x10] sm:$0xff]  }
  0x63   :  { %733 = vmatmul.mubr.msk.bf16.vlgmr.msra.gmra.mrb[0].mxu0 %vm124_vm1, %v100_v6  ;;  %v801_v27 = vld [vmem:[#allocation8 + $0x58] sm:$0xff]   ;;  %v803_v29 = vld [vmem:[#allocation8 + $0x60] sm:$0xff]   ;;  %v805_v31 = vld [vmem:[#allocation8 + $0x68] sm:$0xff]   ;;  %v190_v52 = vsub.s32 0, %v189_v51  ;;  %v194_v54 = vsub.s32 1, %v189_v51 }
  0x64   :  { %698 = vmatpush3.bf16.msra.mxu0 %v796_v22  ;;  %v802_v28 = vld [vmem:[#allocation8 + $0x18] sm:$0xff]   ;;  %v804_v30 = vld [vmem:[#allocation8 + $0x20] sm:$0xff]   ;;  %v806_v32 = vld [vmem:[#allocation8 + $0x28] sm:$0xff]  }
  0x65   :  { %283 = vmatpush1.bf16.msra.mxu1 %v779_v9  ;;  %699 = vmatprep.subr.bf16.mxu0 %v797_v23  ;;  %v648_v33 = vld [vmem:[%s1135_s2] ss:$0 sm:$0xff]  ;;  %v807_v41 = vld [vmem:[#allocation8 + $0x70] sm:$0xff]   ;;  %v809_v43 = vld [vmem:[#allocation8 + $0x78] sm:$0xff]  }
  0x66   :  { %284 = vmatprep.subr.bf16.mxu1 %v780_v10  ;;  %v808_v42 = vld [vmem:[#allocation8 + $0x30] sm:$0xff]   ;;  %v810_v44 = vld [vmem:[#allocation8 + $0x38] sm:$0xff]   ;;  %v811_v45 = vld [vmem:[#allocation10] sm:$0xff]  }
  0x67   :  { %v812_v46 = vld [vmem:[#allocation10 + $0x8] sm:$0xff]   ;;  %v813_v47 = vld [vmem:[#allocation10 + $0x10] sm:$0xff]   ;;  %v814_v48 = vld [vmem:[#allocation10 + $0x18] sm:$0xff]  }
  0x68   :  { %700 = vmatpush3.bf16.msra.mxu0 %v798_v24  ;;  %v815_v49 = vld [vmem:[#allocation10 + $0x20] sm:$0xff]   ;;  %v186_v53 = vld [vmem:[%s1137_s4] sm:$0x3]  ;;  %v817_v7 = vld [vmem:[#allocation10 + $0x30] sm:$0xff]  }
  0x69   :  { %285 = vmatpush1.bf16.msra.mxu1 %v782_v11  ;;  %701 = vmatprep.subr.bf16.mxu0 %v799_v25  ;;  %v191_v55 = vrot.slane %v186_v53, %v190_v52  ;;  %v195_v56 = vrot.slane %v186_v53, %v194_v54  ;;  %v816_v6 = vld [vmem:[#allocation10 + $0x28] sm:$0xff]   ;;  %v818_v8 = vld [vmem:[#allocation10 + $0x38] sm:$0xff]  }
  0x6a   :  { %286 = vmatprep.subr.bf16.mxu1 %v783_v12  ;;  %v668_v10 = vld [vmem:[%s1139_s6] ss:$0 sm:$0xff]  ;;  %s975_s6 = smov [#allocation11]  }
  0x6b   :  { %s637_s13 = sshll.u32 %s975_s6, 4  ;;  %s638_s13 = int_to_ptr.vmem [resolvable:$true] %s637_s13 }
  0x6c   :  { %702 = vmatpush3.bf16.msra.mxu0 %v800_v26  ;;  %p938_p13 = scmp.lt.s32.totalorder %s638_s13, %s638_s13 }
  0x6d   :  { %287 = vmatpush1.bf16.msra.mxu1 %v785_v13  ;;  %703 = vmatprep.subr.bf16.mxu0 %v801_v27 }
  0x6e   :  { %288 = vmatprep.subr.bf16.mxu1 %v786_v14 }
  0x70   :  { %704 = vmatpush3.bf16.msra.mxu0 %v802_v28 }
  0x71   :  { %289 = vmatpush1.bf16.msra.mxu1 %v788_v15  ;;  %705 = vmatprep.subr.bf16.mxu0 %v803_v29 }
  0x72   :  { %290 = vmatprep.subr.bf16.mxu1 %v789_v16 }
  0x74   :  { %706 = vmatpush3.bf16.msra.mxu0 %v804_v30 }
  0x75   :  { %291 = vmatpush1.bf16.msra.mxu1 %v791_v17  ;;  %707 = vmatprep.subr.bf16.mxu0 %v805_v31 }
  0x76   :  { %292 = vmatprep.subr.bf16.mxu1 %v792_v18 }
  0x78   :  { %708 = vmatpush3.bf16.msra.mxu0 %v806_v32 }
  0x79   :  { %293 = vmatpush1.bf16.msra.mxu1 %v794_v19  ;;  %709 = vmatprep.subr.bf16.mxu0 %v807_v41  ;;  %v618_v19 = vand.u32 127, %v188_v50 }
  0x7a   :  { %736 = vmatprep.subr.bf16.mxu1 %v972_v0 }
  0x7b   :  { %vm619_vm5 = vcmp.lt.s32.totalorder %v618_v19, 8 }
  0x7c   :  { %710 = vmatpush3.bf16.msra.mxu0 %v808_v42 }
  0x7d   :  { %711 = vmatprep.subr.bf16.mxu0 %v809_v43 }
  0x80   :  { %712 = vmatpush3.bf16.msra.mxu0 %v810_v44 }
 0x136   :  { %v162_v34 = vpop.f32.mrb[0].mxu0 }
 0x137   :  { %v163_v35 = vadd.f32 %v648_v33, %v162_v34  ;;  %v734_v36 = vpop.f32.mrb[1].mxu0 }
 0x138   :  { %v165_v37 = vpop.f32.mrb[2].mxu0 }
 0x139   :  { %v168_v38 = vmax.f32 %v163_v35, 0.0  ;;  %v735_v39 = vpop.f32.mrb[3].mxu0 }
 0x13b   :  { %v169_v40 = vpack.c.bf16 %v168_v38, %v168_v38 }
 0x13d   :  { %311 = vmatmul.mubr.bf16.vlgmr.msra.gmra.mrb[0].mxu1 %v169_v40 }
 0x13e   :  { %752 = vmatprep.mubr.msk.bf16.mxu1 %vm973_vm0, %v972_v0  ;;  %737 = vmatpush3.bf16.msra.mxu1 %v811_v45 }
 0x13f   :  { %738 = vmatprep.subr.bf16.mxu1 %v972_v0 }
 0x142   :  { %739 = vmatpush3.bf16.msra.mxu1 %v812_v46 }
 0x143   :  { %740 = vmatprep.subr.bf16.mxu1 %v972_v0 }
 0x146   :  { %741 = vmatpush3.bf16.msra.mxu1 %v813_v47 }
 0x147   :  { %742 = vmatprep.subr.bf16.mxu1 %v972_v0 }
 0x14a   :  { %743 = vmatpush3.bf16.msra.mxu1 %v814_v48 }
 0x14b   :  { %744 = vmatprep.subr.bf16.mxu1 %v972_v0 }
 0x14e   :  { %745 = vmatpush3.bf16.msra.mxu1 %v815_v49 }
 0x14f   :  { %746 = vmatprep.subr.bf16.mxu1 %v972_v0 }
 0x152   :  { %747 = vmatpush3.bf16.msra.mxu1 %v816_v6 }
 0x153   :  { %748 = vmatprep.subr.bf16.mxu1 %v972_v0 }
 0x156   :  { %749 = vmatpush3.bf16.msra.mxu1 %v817_v7 }
 0x157   :  { %750 = vmatprep.subr.bf16.mxu1 %v972_v0  ;;  %v685_v0 = vld [vmem:[%s1141_s8] ss:$0 sm:$0xff]  ;;  %s933_s8 = scalar_lea.vmem %s638_s13, 128 }
 0x158   :  { %p934_p12 = scmp.ne.s32.totalorder %s638_s13, %s933_s8  ;;  %p939_p0 = scmp.lt.s32.totalorder %s933_s8, %s933_s8 }
 0x15a   :  { %751 = vmatpush3.bf16.msra.mxu1 %v818_v8  ;;  %p940_p1 = por %p939_p0, %p938_p13 }
 0x15c   :  { %p941_p2 = pnand %p940_p1, %p934_p12 }
 0x210   :  { %v312_v57 = vpop.f32.mrb[0].mxu1 }
 0x211   :  { %v313_v58 = vadd.f32 %v312_v57, %v191_v55  ;;  %v314_v59 = vpop.f32.mrb[1].mxu1 }
 0x212   :  { %v315_v60 = vadd.f32 %v314_v59, %v195_v56  ;;  %v316_v61 = vpop.f32.mrb[2].mxu1 }
 0x213   :  { %vm319_vm2 = vcmp.gt.f32.partialorder %v313_v58, 0.0  ;;  %v321_v62 = vmul.f32 0.01, %v313_v58  ;;  %v317_v63 = vpop.f32.mrb[3].mxu1 }
 0x214   :  { %vm320_vm3 = vcmp.gt.f32.partialorder %v315_v60, 0.0  ;;  %v322_v1 = vmul.f32 0.01, %v315_v60 }
 0x215   :  { %v323_v2 = vsel %vm319_vm2, %v313_v58, %v321_v62 }
 0x216   :  { %v324_v3 = vsel %vm320_vm3, %v315_v60, %v322_v1  ;;  %v325_v5 = vpack.c.bf16 %v323_v2, %v323_v2 }
 0x217   :  { %v326_v4 = vpack.c.bf16 %v324_v3, %v324_v3 }
 0x219   :  { %494 = vmatprep.mubr.bf16.mxu0 %v326_v4 }
 0x21a   :  { %495 = vmatmul.mubr.bf16.vlgmr.msra.gmra.mrb[4].mxu0 %v325_v5 }
 0x2ed   :  { %v713_v9 = vpop.f32.mrb[4].mxu0 }
 0x2ee   :  { %v714_v11 = vpop.f32.mrb[5].mxu0 }
 0x2ef   :  { %v715_v12 = vadd.f32 %v714_v11, %v713_v9  ;;  %v716_v13 = vpop.f32.mrb[6].mxu0 }
 0x2f0   :  { %v717_v14 = vpop.f32.mrb[7].mxu0 }
 0x2f1   :  { %v497_v15 = vadd.f32 %v715_v12, %v668_v10 }
 0x2f3   :  { %vm502_vm4 = vcmp.gt.f32.partialorder %v497_v15, 0.0  ;;  %v503_v16 = vmul.f32 0.01, %v497_v15 }
 0x2f5   :  { %v504_v17 = vsel %vm502_vm4, %v497_v15, %v503_v16 }
 0x2f6   :  { %v505_v18 = vpack.c.bf16 %v504_v17, %v504_v17 }
 0x2f8   :  { %753 = vmatmul.mubr.bf16.vlgmr.msra.gmra.mrb[4].mxu1 %v505_v18 }
 0x3cb   :  { %v611_v20 = vpop.f32.mrb[4].mxu1 }
 0x3cc   :  { %v612_v21 = vadd.f32 %v685_v0, %v611_v20  ;;  %v754_v22 = vpop.f32.mrb[5].mxu1 }
 0x3cd   :  { %v614_v23 = vpop.f32.mrb[6].mxu1 }
 0x3ce   :  { %v755_v24 = vpop.f32.mrb[7].mxu1  ;;  %v620_v25 = vsel %vm619_vm5, %v612_v21, -inf }
 0x3cf   :  { %621 = vmax.xlane.f32.xlu0 %v620_v25 }
 0x45c   :  { %v622_v26 = vpop.xlane.xlu0 %621 }
 0x45d   :  { %v623_v27 = vsub.f32 %v620_v25, %v622_v26 }
 0x45f   :  { %v624_v28 = vmul.f32 1.442695, %v623_v27 }
 0x461   :  { %819 = vpow2.f32 %v624_v28 }
 0x46b   :  { %v820_v29 = vpop.eup %819 }
 0x46c   :  { %626 = vadd.xlane.f32.xlu0 %v820_v29 }
 0x4f9   :  { %v627_v30 = vpop.xlane.xlu0 %626 }
 0x4fa   :  { %821 = vrcp.f32 %v627_v30 }
 0x504   :  { %v822_v31 = vpop.eup %821 }
 0x505   :  { %v629_v32 = vmul.f32 %v822_v31, %v820_v29 }
 0x507   :  { %630 = vst [vmem:[#allocation11] sm:$0xff] %v629_v32 }
 0x508   :  { %944 = shalt.err (!%p941_p2)
}
 0x509   :  { %s945_s14 = scalar_lea.hbm %s1142_s9, 128 }
 0x50a   :  { %p946_p3 = scmp.ne.s32.totalorder %s1142_s9, %s945_s14  ;;  %p949_p4 = scmp.lt.u32.totalorder %s945_s14, %s1142_s9 }
 0x50c   :  { %p951_p5 = pnand %p949_p4, %p946_p3 }
 0x50e   :  { %954 = shalt.err (!%p951_p5)
}
 0x50f   :  { %640 = dma.vmem_to_hbm [thread:$0]  %s638_s13, 128, %s1142_s9, [#allocation4]  }
 0x510   :  { %961 = dma.done.wait [#allocation4], 128  }
 0x511   :  { %962 = vsyncadd [#allocation4], 4294967168 }
 0x512   :  { %644 = vsyncpa [#allocation3], 1 }
 0x513   :  { %645 = vsyncpa [#allocation6], 1 }
 0x514   :  { %646 = vsyncpa [#allocation9], 1 }
 0x515   :  { %647 = vsyncpa [#allocation4], 1 }

</bundles_post_ra>
